<compile_context>
chip_gen: v7x
topology: tpu7x:2x2x1
jax: 0.10.0
libtpu: 0.0.40
codegen_flags: <defaults>
</compile_context>

<pallas_src>
import jax
import jax.numpy as jnp
from jax.experimental import pallas as pl
from jax.experimental.pallas import tpu as pltpu


# ------------------------------- kernel ------------------------------------ #

def _drofe_kernel(demo_ref, freqs_ref, rot_ref, q_ref, k_ref, oq_ref, ok_ref,
                  cos_s, sin_s):
    b = pl.program_id(0)
    h = pl.program_id(2)

    # cos/sin (EUP) + demographic affine only once per (batch, seq-tile);
    # reused across all heads (head axis is the innermost grid dim).
    @pl.when(h == 0)
    def _():
        age = demo_ref[b, 0]
        gender = demo_ref[b, 1]
        f = freqs_ref[...]
        cos_s[...] = age * jnp.cos(f) + gender
        sin_s[...] = age * jnp.sin(f) + gender

    cos_t = cos_s[...]
    sin_t = sin_s[...]
    rot = rot_ref[...]

    q = q_ref[0, 0].astype(jnp.float32)
    k = k_ref[0, 0].astype(jnp.float32)

    # rotate_every_two(x) == x @ rot (signed pair-swap permutation) -> MXU.
    q_rot = jnp.dot(q, rot, preferred_element_type=jnp.float32)
    k_rot = jnp.dot(k, rot, preferred_element_type=jnp.float32)

    oq_ref[0, 0] = (q * cos_t + q_rot * sin_t).astype(oq_ref.dtype)
    ok_ref[0, 0] = (k * cos_t + k_rot * sin_t).astype(ok_ref.dtype)


# ------------------------------ wrappers ----------------------------------- #

def _pair_rotation_matrix(d):
    """R such that (x @ R)[..., 2i] = -x[..., 2i+1] and (x @ R)[..., 2i+1] = x[..., 2i]."""
    i = jax.lax.broadcasted_iota(jnp.int32, (d, d), 0)
    j = jax.lax.broadcasted_iota(jnp.int32, (d, d), 1)
    sign = jnp.where((j % 2) == 1, 1.0, -1.0)
    return jnp.where(i == (j ^ 1), sign, 0.0).astype(jnp.float32)


def drofe_default_freqs(dim, theta=10000.0, theta_rescale_factor=1.0):
    """dRoFE.__init__ frequencies for freqs_for='lang' (module default)."""
    assert dim % 4 == 0, "head dim must be divisible by 4"
    theta = theta * theta_rescale_factor ** (dim / (dim - 2))
    rotary_dim = dim // 2
    exps = jnp.arange(0, rotary_dim, 2, dtype=jnp.float32)[: rotary_dim // 2] / rotary_dim
    return 1.0 / (theta ** exps)


def build_freqs_2d(freq_band_pos, freqs):
    """[S, 2] band boundaries x [dim//4] freqs -> interleaved [S, dim] table."""
    lower = freq_band_pos[..., 0].astype(freqs.dtype)
    upper = freq_band_pos[..., 1].astype(freqs.dtype)
    lower_f = lower[:, None] * freqs[None, :]                 # [S, F]
    upper_f = upper[:, None] * freqs[None, :]                 # [S, F]
    inter = jnp.stack([lower_f, upper_f], axis=-1)            # [S, F, 2]
    flat = inter.reshape(inter.shape[0], -1)                  # [S, 2F]  (lo0,up0,lo1,up1,...)
    return jnp.repeat(flat, 2, axis=-1)                       # [S, 4F] == [S, dim]


def drofe_rotate(q, k, demographic_info, freqs_2d, *, max_seq_tile=512):
    B, H, S, D = q.shape
    assert k.shape == q.shape
    assert freqs_2d.shape == (S, D)
    assert demographic_info.shape == (B, 2)

    # Seq tile: full S for small tables, otherwise a multiple-of-8 tile that
    # keeps the double-buffered blocks well inside every generation's VMEM.
    ts = S if S <= max_seq_tile else max_seq_tile
    grid = (B, pl.cdiv(S, ts), H)

    rot = _pair_rotation_matrix(D)

    flops = int(2 * B * H * S * D * (2 * D + 4))
    transcendentals = int(2 * B * S * D)
    bytes_accessed = int(4 * B * H * S * D * q.dtype.itemsize
                         + S * D * 4 + D * D * 4 + B * 2 * 4)

    fn = pl.pallas_call(
        _drofe_kernel,
        grid=grid,
        in_specs=[
            pl.BlockSpec(memory_space=pltpu.MemorySpace.SMEM),            # demographics [B, 2]
            pl.BlockSpec((ts, D), lambda b, st, h: (st, 0)),              # freqs_2d tile
            pl.BlockSpec((D, D), lambda b, st, h: (0, 0)),                # pair-swap matrix (resident)
            pl.BlockSpec((1, 1, ts, D), lambda b, st, h: (b, h, st, 0)),  # q tile
            pl.BlockSpec((1, 1, ts, D), lambda b, st, h: (b, h, st, 0)),  # k tile
        ],
        out_specs=(
            pl.BlockSpec((1, 1, ts, D), lambda b, st, h: (b, h, st, 0)),
            pl.BlockSpec((1, 1, ts, D), lambda b, st, h: (b, h, st, 0)),
        ),
        out_shape=(
            jax.ShapeDtypeStruct(q.shape, q.dtype),
            jax.ShapeDtypeStruct(k.shape, k.dtype),
        ),
        scratch_shapes=[
            pltpu.VMEM((ts, D), jnp.float32),   # cos table (per batch, seq-tile)
            pltpu.VMEM((ts, D), jnp.float32),   # sin table
        ],
        compiler_params=pltpu.CompilerParams(
            dimension_semantics=("parallel", "parallel", "arbitrary"),
            vmem_limit_bytes=32 * 1024 * 1024,
        ),
        cost_estimate=pl.CostEstimate(
            flops=flops,
            transcendentals=transcendentals,
            bytes_accessed=bytes_accessed,
        ),
    )
    return fn(demographic_info.astype(jnp.float32),
              freqs_2d.astype(jnp.float32),
              rot, q, k)


def drofe_forward(q, k, demographic_info, freq_band_pos, freqs):
    """Equivalent of dRoFE.forward(q, k, demographic_info) with default config."""
    D = q.shape[-1]
    assert D % 4 == 0
    freqs_2d = build_freqs_2d(freq_band_pos, freqs)   # tiny [S, D] prep (layout plumbing)
    assert freqs_2d.shape[-1] == D, "rotary dim equals head dim for the 'lang' default"
    # TODO(synk): freqs_for='pixel'/'constant', use_xpos (get_scale) scaling,
    # learned_freq gradients and rot_dim < head_dim pass-through are not covered.
    return drofe_rotate(q, k, demographic_info, freqs_2d)


# ------------------------------ reference ---------------------------------- #

def _rotate_every_two_ref(x):
    x1 = x[..., 0::2]
    x2 = x[..., 1::2]
    return jnp.stack([-x2, x1], axis=-1).reshape(x.shape)


def _reference_drofe(q, k, demo, freqs_2d):
    age = demo[:, 0][:, None, None, None]
    gender = demo[:, 1][:, None, None, None]
    f = freqs_2d[None, None]
    fc = age * jnp.cos(f) + gender
    fs = age * jnp.sin(f) + gender
    rq = q * fc + _rotate_every_two_ref(q) * fs
    rk = k * fc + _rotate_every_two_ref(k) * fs
    return rq, rk


# --------------------------------- main ------------------------------------ #

if __name__ == "__main__":
    B, H, S, dim = 2, 4, 16, 128   # head_dim=128 -> lane-dense output stores
    key = jax.random.PRNGKey(0)
    kq, kk, ka, kf = jax.random.split(key, 4)

    # q/k values kept bf16-representable so the MXU pair-swap permutation is
    # bit-exact irrespective of the backend's f32 contraction precision.
    q = jax.random.normal(kq, (B, H, S, dim), jnp.float32)
    q = q.astype(jnp.bfloat16).astype(jnp.float32)
    k = jax.random.normal(kk, (B, H, S, dim), jnp.float32)
    k = k.astype(jnp.bfloat16).astype(jnp.float32)

    age = jax.random.uniform(ka, (B,), jnp.float32, 0.2, 0.9)
    gender = jnp.arange(B, dtype=jnp.float32) % 2.0
    demographic_info = jnp.stack([age, gender], axis=-1)      # [B, 2]

    freq_band_pos = jax.random.uniform(kf, (S, 2), jnp.float32, 0.0, 4.0)  # [S, 2]
    freqs = drofe_default_freqs(dim)                                        # [dim//4]

    rq, rk = jax.jit(drofe_forward)(q, k, demographic_info, freq_band_pos, freqs)
    rq, rk = jax.block_until_ready((rq, rk))

    ref_q, ref_k = _reference_drofe(q, k, demographic_info,
                                    build_freqs_2d(freq_band_pos, freqs))

    assert rq.shape == q.shape and rk.shape == k.shape
    assert rq.dtype == q.dtype and rk.dtype == k.dtype
    assert jnp.allclose(rq, ref_q, atol=1e-5, rtol=1e-5), "rotated_q mismatch vs reference"
    assert jnp.allclose(rk, ref_k, atol=1e-5, rtol=1e-5), "rotated_k mismatch vs reference"

    print("KERNEL_OK")
</pallas_src>

<mosaic_0001>
module attributes {stable_mosaic.version = 11 : i64} {
  func.func @_drofe_kernel(%arg0: i32, %arg1: i32, %arg2: i32, %arg3: memref<2x2xf32, #tpu.memory_space<smem>>, %arg4: memref<16x128xf32, #tpu.memory_space<vmem>>, %arg5: memref<128x128xf32, #tpu.memory_space<vmem>>, %arg6: memref<1x1x16x128xf32, #tpu.memory_space<vmem>>, %arg7: memref<1x1x16x128xf32, #tpu.memory_space<vmem>>, %arg8: memref<1x1x16x128xf32, #tpu.memory_space<vmem>>, %arg9: memref<1x1x16x128xf32, #tpu.memory_space<vmem>>, %arg10: memref<16x128xf32, #tpu.memory_space<vmem>>, %arg11: memref<16x128xf32, #tpu.memory_space<vmem>>) attributes {dimension_semantics = [#tpu.dimension_semantics<parallel>, #tpu.dimension_semantics<parallel>, #tpu.dimension_semantics<arbitrary>], iteration_bounds = array<i64: 2, 1, 4>, scalar_prefetch = 0 : i64, scratch_operands = 2 : i64, tpu.core_type = #tpu.core_type<tc>, window_params = [{transform_indices = @transform_0, window_bounds = array<i64: 2, 2>}, {transform_indices = @transform_1, window_bounds = array<i64: 16, 128>}, {pipeline_mode = #tpu.pipeline_mode<synchronous>, transform_indices = @transform_2, window_bounds = array<i64: 128, 128>}, {transform_indices = @transform_3, window_bounds = array<i64: 1, 1, 16, 128>}, {transform_indices = @transform_4, window_bounds = array<i64: 1, 1, 16, 128>}, {transform_indices = @transform_5, window_bounds = array<i64: 1, 1, 16, 128>}, {transform_indices = @transform_6, window_bounds = array<i64: 1, 1, 16, 128>}]} {
    %c0_i32 = arith.constant 0 : i32
    %0 = arith.cmpi eq, %arg2, %c0_i32 : i32
    %1 = arith.extui %0 : i1 to i32
    %c0_i32_0 = arith.constant 0 : i32
    %2 = arith.cmpi ne, %1, %c0_i32_0 : i32
    scf.if %2 {
      %24 = arith.index_cast %arg0 : i32 to index
      %c0_23 = arith.constant 0 : index
      %25 = memref.load %arg3[%24, %c0_23] : memref<2x2xf32, #tpu.memory_space<smem>>
      %26 = arith.index_cast %arg0 : i32 to index
      %c1 = arith.constant 1 : index
      %27 = memref.load %arg3[%26, %c1] : memref<2x2xf32, #tpu.memory_space<smem>>
      %c0_24 = arith.constant 0 : index
      %c0_25 = arith.constant 0 : index
      %28 = vector.load %arg4[%c0_24, %c0_25] : memref<16x128xf32, #tpu.memory_space<vmem>>, vector<16x128xf32>
      %29 = math.cos %28 : vector<16x128xf32>
      %30 = vector.broadcast %25 : f32 to vector<16x128xf32>
      %31 = arith.mulf %30, %29 : vector<16x128xf32>
      %32 = vector.broadcast %27 : f32 to vector<16x128xf32>
      %33 = arith.addf %31, %32 : vector<16x128xf32>
      %c0_26 = arith.constant 0 : index
      %c0_27 = arith.constant 0 : index
      %34 = vector.load %arg10[%c0_26, %c0_27] : memref<16x128xf32, #tpu.memory_space<vmem>>, vector<16x128xf32>
      tpu.vector_store %arg10[%c0_26, %c0_27], %33 {strides = array<i32>} : memref<16x128xf32, #tpu.memory_space<vmem>>, vector<16x128xf32>,
      %35 = math.sin %28 : vector<16x128xf32>
      %36 = vector.broadcast %25 : f32 to vector<16x128xf32>
      %37 = arith.mulf %36, %35 : vector<16x128xf32>
      %38 = vector.broadcast %27 : f32 to vector<16x128xf32>
      %39 = arith.addf %37, %38 : vector<16x128xf32>
      %c0_28 = arith.constant 0 : index
      %c0_29 = arith.constant 0 : index
      %40 = vector.load %arg11[%c0_28, %c0_29] : memref<16x128xf32, #tpu.memory_space<vmem>>, vector<16x128xf32>
      tpu.vector_store %arg11[%c0_28, %c0_29], %39 {strides = array<i32>} : memref<16x128xf32, #tpu.memory_space<vmem>>, vector<16x128xf32>,
    } else {
    }
    %c0 = arith.constant 0 : index
    %c0_1 = arith.constant 0 : index
    %3 = vector.load %arg10[%c0, %c0_1] : memref<16x128xf32, #tpu.memory_space<vmem>>, vector<16x128xf32>
    %c0_2 = arith.constant 0 : index
    %c0_3 = arith.constant 0 : index
    %4 = vector.load %arg11[%c0_2, %c0_3] : memref<16x128xf32, #tpu.memory_space<vmem>>, vector<16x128xf32>
    %c0_4 = arith.constant 0 : index
    %c0_5 = arith.constant 0 : index
    %5 = vector.load %arg5[%c0_4, %c0_5] : memref<128x128xf32, #tpu.memory_space<vmem>>, vector<128x128xf32>
    %c0_6 = arith.constant 0 : index
    %c0_7 = arith.constant 0 : index
    %c0_8 = arith.constant 0 : index
    %c0_9 = arith.constant 0 : index
    %6 = vector.load %arg6[%c0_6, %c0_7, %c0_8, %c0_9] : memref<1x1x16x128xf32, #tpu.memory_space<vmem>>, vector<1x1x16x128xf32>
    %7 = vector.shape_cast %6 : vector<1x1x16x128xf32> to vector<16x128xf32>
    %c0_10 = arith.constant 0 : index
    %c0_11 = arith.constant 0 : index
    %c0_12 = arith.constant 0 : index
    %c0_13 = arith.constant 0 : index
    %8 = vector.load %arg7[%c0_10, %c0_11, %c0_12, %c0_13] : memref<1x1x16x128xf32, #tpu.memory_space<vmem>>, vector<1x1x16x128xf32>
    %9 = vector.shape_cast %8 : vector<1x1x16x128xf32> to vector<16x128xf32>
    %cst = arith.constant dense<0.000000e+00> : vector<16x128xf32>
    %10 = tpu.matmul %7, %5, %cst {dimension_numbers = #tpu.dot_dimension_numbers<[1], [0], [0], [1], [0, 0, 1, 1], [], []>} : vector<16x128xf32>, vector<128x128xf32>, vector<16x128xf32> -> vector<16x128xf32>
    %cst_14 = arith.constant dense<0.000000e+00> : vector<16x128xf32>
    %11 = tpu.matmul %9, %5, %cst_14 {dimension_numbers = #tpu.dot_dimension_numbers<[1], [0], [0], [1], [0, 0, 1, 1], [], []>} : vector<16x128xf32>, vector<128x128xf32>, vector<16x128xf32> -> vector<16x128xf32>
    %12 = arith.mulf %7, %3 : vector<16x128xf32>
    %13 = arith.mulf %10, %4 : vector<16x128xf32>
    %14 = arith.addf %12, %13 : vector<16x128xf32>
    %c0_15 = arith.constant 0 : index
    %c0_16 = arith.constant 0 : index
    %c0_17 = arith.constant 0 : index
    %c0_18 = arith.constant 0 : index
    %15 = vector.load %arg8[%c0_15, %c0_16, %c0_17, %c0_18] : memref<1x1x16x128xf32, #tpu.memory_space<vmem>>, vector<1x1x16x128xf32>
    %16 = vector.shape_cast %15 : vector<1x1x16x128xf32> to vector<16x128xf32>
    %17 = vector.shape_cast %14 : vector<16x128xf32> to vector<1x1x16x128xf32>
    tpu.vector_store %arg8[%c0_15, %c0_16, %c0_17, %c0_18], %17 {strides = array<i32>} : memref<1x1x16x128xf32, #tpu.memory_space<vmem>>, vector<1x1x16x128xf32>,
    %18 = arith.mulf %9, %3 : vector<16x128xf32>
    %19 = arith.mulf %11, %4 : vector<16x128xf32>
    %20 = arith.addf %18, %19 : vector<16x128xf32>
    %c0_19 = arith.constant 0 : index
    %c0_20 = arith.constant 0 : index
    %c0_21 = arith.constant 0 : index
    %c0_22 = arith.constant 0 : index
    %21 = vector.load %arg9[%c0_19, %c0_20, %c0_21, %c0_22] : memref<1x1x16x128xf32, #tpu.memory_space<vmem>>, vector<1x1x16x128xf32>
    %22 = vector.shape_cast %21 : vector<1x1x16x128xf32> to vector<16x128xf32>
    %23 = vector.shape_cast %20 : vector<16x128xf32> to vector<1x1x16x128xf32>
    tpu.vector_store %arg9[%c0_19, %c0_20, %c0_21, %c0_22], %23 {strides = array<i32>} : memref<1x1x16x128xf32, #tpu.memory_space<vmem>>, vector<1x1x16x128xf32>,
    return
  }
  func.func @transform_0(%arg0: i32, %arg1: i32, %arg2: i32) -> (i32, i32) {
    %c0_i32 = arith.constant 0 : i32
    %c0_i32_0 = arith.constant 0 : i32
    %c0_i32_1 = arith.constant 0 : i32
    return %c0_i32, %c0_i32_0 : i32, i32
  }
  func.func @transform_1(%arg0: i32, %arg1: i32, %arg2: i32) -> (i32, i32) {
    %c0_i32 = arith.constant 0 : i32
    %c0_i32_0 = arith.constant 0 : i32
    return %arg1, %c0_i32 : i32, i32
  }
  func.func @transform_2(%arg0: i32, %arg1: i32, %arg2: i32) -> (i32, i32) {
    %c0_i32 = arith.constant 0 : i32
    %c0_i32_0 = arith.constant 0 : i32
    %c0_i32_1 = arith.constant 0 : i32
    return %c0_i32, %c0_i32_0 : i32, i32
  }
  func.func @transform_3(%arg0: i32, %arg1: i32, %arg2: i32) -> (i32, i32, i32, i32) {
    %c0_i32 = arith.constant 0 : i32
    %c0_i32_0 = arith.constant 0 : i32
    return %arg0, %arg2, %arg1, %c0_i32 : i32, i32, i32, i32
  }
  func.func @transform_4(%arg0: i32, %arg1: i32, %arg2: i32) -> (i32, i32, i32, i32) {
    %c0_i32 = arith.constant 0 : i32
    %c0_i32_0 = arith.constant 0 : i32
    return %arg0, %arg2, %arg1, %c0_i32 : i32, i32, i32, i32
  }
  func.func @transform_5(%arg0: i32, %arg1: i32, %arg2: i32) -> (i32, i32, i32, i32) {
    %c0_i32 = arith.constant 0 : i32
    %c0_i32_0 = arith.constant 0 : i32
    return %arg0, %arg2, %arg1, %c0_i32 : i32, i32, i32, i32
  }
  func.func @transform_6(%arg0: i32, %arg1: i32, %arg2: i32) -> (i32, i32, i32, i32) {
    %c0_i32 = arith.constant 0 : i32
    %c0_i32_0 = arith.constant 0 : i32
    return %arg0, %arg2, %arg1, %c0_i32 : i32, i32, i32, i32
  }
}

</mosaic_0001>

<bundles_post_ra>
// kernel: drofe_forward.1
= control target key start
LH: loop header
LB: loop body
LE: loop exit
PB: predicated region body
PF: predicated region fallthrough
CT: control target
= control target key end

     0   :  { %s2113_s0 = inlined_call_operand.vmem [shape: f32[2,2], index: 0, kind: input, shape index: {}]   ;;  %s2114_s1 = inlined_call_operand.vmem [shape: f32[16,128], index: 1, kind: input, shape index: {}]   ;;  %s2115_s2 = inlined_call_operand.vmem [shape: f32[128,128], index: 2, kind: input, shape index: {}]   ;;  %s2116_s3 = inlined_call_operand.vmem [shape: f32[2,4,16,128], index: 3, kind: input, shape index: {}]   ;;  %s2117_s4 = inlined_call_operand.vmem [shape: f32[2,4,16,128], index: 4, kind: input, shape index: {}]   ;;  %s2118_s5 = inlined_call_operand.hbm [shape: f32[2,4,16,128], index: 5, kind: output, shape index: {0}]   ;;  %s2119_s6 = inlined_call_operand.hbm [shape: f32[2,4,16,128], index: 6, kind: output, shape index: {1}]  }
   0x1   :  { %2124 = sst [smem:[#allocation17_spill]] %s2113_s0 }
   0x2   :  { %12 = vsyncpa [#allocation6], 0 }
   0x3   :  { %13 = vsyncpa [#allocation5], 0 }
   0x4   :  { %15 = vsyncpa [#allocation5 + $0x1], 0 }
   0x5   :  { %16 = vsyncpa [#allocation9], 0 }
   0x6   :  { %18 = vsyncpa [#allocation9 + $0x1], 0  ;;  %s1776_s21 = smov 0   ;;  %s1778_s22 = smov 0  }
   0x7   :  { %s1780_s23 = smov 0   ;;  %s1782_s24 = smov 0  }
   0x8   :  { %s1784_s25 = smov 0   ;;  %s1786_s26 = smov 0  }
   0x9   :  { %s1788_s27 = smov 0   ;;  %s1790_s28 = smov 0  }
   0xa LB: > { %2125 = sst [smem:[#allocation13_spill]] %s1720_s26  ;;  %s1258_s29 = sadd.s32 4294967295, %s1728_s28   ;;  %s1728_s28 = sphi %s1790_s28, %s24_s28   ;;  %s1724_s27 = sphi %s1788_s27, %s2138_s27   ;;  %s1720_s26 = sphi %s1786_s26, %s2137_s26   ;;  %s1716_s25 = sphi %s1784_s25, %s2136_s25   ;;  %s1712_s24 = sphi %s1782_s24, %s2135_s24   ;;  %s1708_s23 = sphi %s1780_s23, %s2141_s23   ;;  %s1704_s22 = sphi %s1778_s22, %s2140_s22   ;;  %s1700_s21 = sphi %s1776_s21, %s2139_s21  }
   0xb   : > { %2126 = sst [smem:[#allocation14_spill]] %s1724_s27  ;;  %s1259_s30 = sadd.s32 4294967294, %s1728_s28  }
   0xc   : > { %s36_s7 = sadd.s32 1, %s1720_s26  ;;  %s43_s8 = sadd.s32 1, %s1724_s27 }
   0xd   : > { %p37_p0 = scmp.ge.s32.totalorder %s36_s7, 4  ;;  %s182_s9 = sadd.s32 1, %s1708_s23 }
   0xe   : > { %p192_p1 = scmp.ne.s32.totalorder %s1708_s23, %s1704_s22  ;;  %p193_p2 = scmp.eq.s32.totalorder %s1258_s29, 7 }
   0xf   : > { %s2143_s7 = smov (%p37_p0, %s36_s7), 0  ;;  %s2145_s8 = smov (!%p37_p0, %s43_s8), %s1724_s27 }
  0x10   : > { %2127 = sst [smem:[#allocation15_spill]] %s2143_s7  ;;  %s176_s10 = ssub.s32 %s1720_s26, %s2143_s7 }
  0x11   : > { %p1828_p3 = por %p193_p2, %p192_p1  ;;  %p45_p4 = scmp.ge.s32.totalorder %s2145_s8, 2 }
  0x12   : > { %p198_p5 = scmp.ne.s32.totalorder %s1704_s22, %s1700_s21  ;;  %p199_p6 = scmp.eq.s32.totalorder %s1259_s30, 7 }
  0x13   : > { %p1260_p7 = scmp.ge.s32.totalorder %s1728_s28, 1  ;;  %s2147_s8 = smov (%p45_p4, %s2145_s8), 0 }
  0x14   : > { %2129 = sst [smem:[#allocation16_spill]] %s2147_s8  ;;  %p1837_p8 = por %p199_p6, %p198_p5 }
  0x15   : > { %p236_p9 = scmp.lt.s32.totalorder %s1728_s28, 9  ;;  %s175_s13 = ssub.s32 %s1724_s27, %s2147_s8 }
  0x16   : > { %s2130_s12 = scalar_select %p1837_p8, 1, 0 }
  0x17   : > { %s177_s14 = sor.u32 %s176_s10, %s175_s13  ;;  %p1844_p10 = pnand %p1260_p7, %p236_p9 }
  0x18   : > { %p180_p11 = scmp.eq.s32.totalorder %s177_s14, 0  ;;  %p1848_p12 = scmp.eq.s32.totalorder %s1258_s29, 0 }
  0x19   : > { %p1488_p13 = pneg %p1844_p10  ;;  %s2133_s0 = sld [smem:[#allocation17_spill]] }
  0x1a   : > { %s1858_s20 = scalar_select %p180_p11, %s1708_s23, %s182_s9  }
  0x1b   : > { %p1489_p0 = pnand %p1848_p12, %p1488_p13 }
  0x1d   : > { %p1585_p2 = pneg %p1489_p0 }
  0x1f   : > { %s249_s19 = sshll.u32 %s2133_s0, 4  ;;  %s250_s19 = int_to_ptr.vmem [resolvable:$true] %s249_s19 }
  0x20   : > { %s1583_s30 = scalar_lea.vmem %s250_s19, 32  ;;  %p1591_p6 = scmp.lt.s32.totalorder %s250_s19, %s250_s19 }
  0x21   : > { %p1584_p1 = scmp.ne.s32.totalorder %s250_s19, %s1583_s30  ;;  %p1592_p7 = scmp.lt.s32.totalorder %s1583_s30, %s1583_s30 }
  0x23   : > { %p1586_p4 = pnand %p1585_p2, %p1584_p1  ;;  %p1593_p9 = por %p1592_p7, %p1591_p6 }
  0x25   : > { %p1587_p5 = pneg %p1586_p4 }
  0x27   : > { %p1594_p8 = pnand %p1593_p9, %p1587_p5 }
  0x29   : > { %1597 = shalt.err (!%p1594_p8)
}
  0x2a   : > { %s1730_s29 = smov [#allocation4]   ;;  %308 = sbr.rel (%p1844_p10) target bundleno = 444 (0x1bc), region = 40 }
  0x2b   : > { %1491 = dma.vmem_to_smem (!%p1489_p0), %s250_s19, 32, %s1730_s29, [#allocation6]  }
  0x31   : > { %1687 = dma.done.wait (%p1848_p12), [#allocation6], 32  }
  0x32   : > { %1689 = vsyncadd (%p1848_p12), [#allocation6], 4294967264 }
  0x33   : > { %314 = sfence }
  0x34   : > { %s1869_s9 = sand.u32 1, %s1704_s22   ;;  %p377_p8 = scmp.lt.s32.totalorder %s1716_s25, 1 }
  0x35   : > { %s1266_s10 = sshll.u32 %s1869_s9, 4  ;;  %p379_p11 = scmp.lt.s32.totalorder %s1712_s24, 3 }
  0x36   : > { %s378_s13 = scalar_select %p377_p8, %s1716_s25, 1 }
  0x37   : > { %s380_s14 = scalar_select %p379_p11, %s1712_s24, 3 }
  0x38   : > { %s1269_s15 = sshll.u32 %s378_s13, 3  ;;  %s1886_s27 = scalar_lea.vmem [#allocation7], %s1266_s10 }
  0x39   : > { %s1268_s17 = sshll.u32 %s380_s14, 1  ;;  %s1888_s26 = scalar_lea.vmem [#allocation8], %s1266_s10 }
  0x3a   : > { %s386_s18 = sadd.s32 %s1269_s15, %s1268_s17  ;;  %p1274_p10 = scmp.ne.s32.totalorder %s1712_s24, 0 }
  0x3b   : > { %s1270_s19 = sshll.u32 %s386_s18, 3  ;;  %v1894_v0 = vld [vmem:[%s2114_s1] sm:$0xff] (!%p1274_p10)  ;;  %v1901_v3 = vld [vmem:[%s2114_s1 + $0x8] sm:$0xff] (!%p1274_p10)  ;;  %v1731_v20 = vmov (!%p1274_p10), 683565275   ;;  %s1275_s8 = sshll.u32 (!%p1274_p10), %s1716_s25, 7 }
  0x3c   : > { %s1879_s29 = scalar_lea.vmem %s2116_s3, %s1270_s19  ;;  %s1884_s7 = scalar_lea.vmem %s2117_s4, %s1270_s19  ;;  %v416_v1 = vand.u32 (!%p1274_p10), 2147483647, %v1894_v0  ;;  %v419_v2 = vand.u32 (!%p1274_p10), 2139095040, %v1894_v0  ;;  %v522_v7 = vand.u32 (!%p1274_p10), 2139095040, %v1901_v3  ;;  %v519_v8 = vand.u32 (!%p1274_p10), 2147483647, %v1901_v3 }
  0x3d   : > { %409 = sbr.rel (%p1274_p10) target bundleno = 154 (0x9a), region = 48  ;;  %v1732_v22 = vmov (!%p1274_p10), 2475754826   ;;  %v1733_v24 = vmov (!%p1274_p10), 2131351028   ;;  %vm418_vm14 = vcmp.lt.s32.totalorder (!%p1274_p10), %v1894_v0, 0 }
  0x3e   : > { %v420_v4 = vshrl.u32 (!%p1274_p10), %v419_v2, 23  ;;  %v423_v5 = vand.u32 (!%p1274_p10), 8388607, %v416_v1  ;;  %v523_v10 = vshrl.u32 (!%p1274_p10), %v522_v7, 23  ;;  %v526_v14 = vand.u32 (!%p1274_p10), 8388607, %v519_v8 }
  0x3f   : > { %v1734_v26 = vmov (!%p1274_p10), 2102212464   ;;  %v1735_v28 = vmov (!%p1274_p10), 920167782   ;;  %v1736_v36 = vmov (!%p1274_p10), 1326507024  }
  0x40   : > { %v1276_v6 = vadd.s32 (!%p1274_p10), 4294967169, %v420_v4  ;;  %v424_v11 = vor.u32 (!%p1274_p10), 8388608, %v423_v5  ;;  %v1280_v12 = vadd.s32 (!%p1274_p10), 4294967169, %v523_v10  ;;  %v527_v30 = vor.u32 (!%p1274_p10), 8388608, %v526_v14  ;;  %s412_s10 = sadd.s32 (!%p1274_p10), 1, %s1275_s8  ;;  %s411_s17 = sld [smem:[#allocation4 + %s1275_s8]] (!%p1274_p10) }
  0x41   : > { %vm417_vm15 = vcmp.le.f32.partialorder (!%p1274_p10), %v416_v1, 0.7853982  ;;  %s413_s18 = sld [smem:[#allocation4 + %s412_s10]] (!%p1274_p10) }
  0x42   : > { %v426_v9 = vadd.s32 (!%p1274_p10), 1, %v1276_v6  ;;  %v1909_v17 = vshll.u32 (!%p1274_p10), %v424_v11, 8  ;;  %v529_v18 = vadd.s32 (!%p1274_p10), 1, %v1280_v12  ;;  %v567_v58 = vshll.u32 (!%p1274_p10), %v527_v30, 8 }
  0x44   : > { %vm427_vm0 = vcmp.gt.s32.totalorder %v426_v9, 0  ;;  %vm530_vm4 = vcmp.gt.s32.totalorder %v529_v18, 0 }
  0x45   : > { %v428_v13 = vsel %vm427_vm0, %v426_v9, 0  ;;  %v531_v43 = vsel %vm530_vm4, %v529_v18, 0  ;;  %vm521_vm0 = vcmp.lt.s32.totalorder %v1901_v3, 0 }
  0x46   : > { %v429_v15 = vshrl.u32 %v428_v13, 5  ;;  %v430_v16 = vand.u32 31, %v428_v13  ;;  %v532_v53 = vshrl.u32 %v531_v43, 5  ;;  %v533_v54 = vand.u32 31, %v531_v43 }
  0x48   : > { %v431_v19 = vsub.s32 32, %v430_v16  ;;  %v433_v21 = vshll.u32 %v1731_v20, %v430_v16  ;;  %v436_v23 = vshll.u32 %v1732_v22, %v430_v16  ;;  %v439_v25 = vshll.u32 %v1733_v24, %v430_v16 }
  0x49   : > { %v442_v27 = vshll.u32 %v1734_v26, %v430_v16  ;;  %v445_v29 = vshll.u32 %v1735_v28, %v430_v16  ;;  %vm448_vm1 = vcmp.lt.s32.totalorder %v429_v15, 1  ;;  %vm449_vm2 = vcmp.lt.s32.totalorder %v429_v15, 2 }
  0x4a   : > { %v432_v31 = vshrl.u32 %v1731_v20, %v431_v19  ;;  %v434_v32 = vshrl.u32 %v1732_v22, %v431_v19  ;;  %v437_v33 = vshrl.u32 %v1733_v24, %v431_v19  ;;  %v440_v34 = vshrl.u32 %v1734_v26, %v431_v19 }
  0x4b   : > { %v443_v35 = vshrl.u32 %v1735_v28, %v431_v19  ;;  %v446_v37 = vshrl.u32 %v1736_v36, %v431_v19  ;;  %vm451_vm3 = vcmp.lt.s32.totalorder %v429_v15, 4  ;;  %vm450_vm5 = vcmp.lt.s32.totalorder %v429_v15, 3 }
  0x4c   : > { %v435_v38 = vor.u32 %v434_v32, %v433_v21  ;;  %v438_v39 = vor.u32 %v437_v33, %v436_v23  ;;  %v441_v40 = vor.u32 %v440_v34, %v439_v25  ;;  %v534_v63 = vsub.s32 32, %v533_v54 }
  0x4d   : > { %v444_v41 = vor.u32 %v443_v35, %v442_v27  ;;  %v447_v42 = vor.u32 %v446_v37, %v445_v29  ;;  %v536_v2 = vshll.u32 %v1731_v20, %v533_v54  ;;  %v539_v4 = vshll.u32 %v1732_v22, %v533_v54 }
  0x4e   : > { %v452_v44 = vsel %vm448_vm1, %v432_v31, %v435_v38  ;;  %v453_v45 = vsel %vm451_vm3, %v441_v40, 2102212464  ;;  %v456_v46 = vsel %vm448_vm1, %v435_v38, %v438_v39  ;;  %v460_v47 = vsel %vm448_vm1, %v438_v39, %v441_v40 }
  0x4f   : > { %v454_v48 = vsel %vm450_vm5, %v438_v39, %v453_v45  ;;  %v457_v49 = vsel %vm451_vm3, %v444_v41, 920167782  ;;  %v461_v50 = vsel %vm451_vm3, %v447_v42, 1326507024  ;;  %v542_v5 = vshll.u32 %v1733_v24, %v533_v54 }
  0x50   : > { %v458_v51 = vsel %vm450_vm5, %v441_v40, %v457_v49  ;;  %v462_v52 = vsel %vm450_vm5, %v444_v41, %v461_v50  ;;  %v455_v55 = vsel %vm449_vm2, %v452_v44, %v454_v48  ;;  %v545_v7 = vshll.u32 %v1734_v26, %v533_v54 }
  0x51   : > { %v459_v56 = vsel %vm449_vm2, %v456_v46, %v458_v51  ;;  %v463_v57 = vsel %vm449_vm2, %v460_v47, %v462_v52  ;;  %v471_v6 = vmul.u32 %v1909_v17, %v455_v55  ;;  %v548_v9 = vshll.u32 %v1735_v28, %v533_v54 }
  0x52   : > { %v1918_v59 = vmul.u32.u64.low %v1909_v17, %v463_v57  ;;  %v1919_v60 = vmul.u32.u64.high %v1909_v17, %v463_v57, %v1918_v59  ;;  %v1922_v61 = vmul.u32.u64.low %v1909_v17, %v459_v56  ;;  %v1923_v62 = vmul.u32.u64.high %v1909_v17, %v459_v56, %v1922_v61 }
  0x53   : > { %vm551_vm6 = vcmp.lt.s32.totalorder %v532_v53, 1  ;;  %v535_v10 = vshrl.u32 %v1731_v20, %v534_v63  ;;  %v537_v11 = vshrl.u32 %v1732_v22, %v534_v63  ;;  %v540_v12 = vshrl.u32 %v1733_v24, %v534_v63 }
  0x54   : > { %v543_v13 = vshrl.u32 %v1734_v26, %v534_v63  ;;  %vm473_vm7 = vc.u32 %v1919_v60, %v1922_v61  ;;  %v474_v14 = vadd.s32 1, %v1923_v62  ;;  %v546_v15 = vshrl.u32 %v1735_v28, %v534_v63 }
  0x55   : > { %vm552_vm8 = vcmp.lt.s32.totalorder %v532_v53, 2  ;;  %v538_v16 = vor.u32 %v537_v11, %v536_v2  ;;  %v541_v18 = vor.u32 %v540_v12, %v539_v4  ;;  %v549_v21 = vshrl.u32 %v1736_v36, %v534_v63 }
  0x56   : > { %v544_v19 = vor.u32 %v543_v13, %v542_v5  ;;  %v475_v23 = vsel %vm473_vm7, %v474_v14, %v1923_v62  ;;  %v547_v17 = vor.u32 %v546_v15, %v545_v7  ;;  %vm553_vm9 = vcmp.lt.s32.totalorder %v532_v53, 3 }
  0x57   : > { %vm554_vm10 = vcmp.lt.s32.totalorder %v532_v53, 4  ;;  %v476_v25 = vadd.s32 %v475_v23, %v471_v6  ;;  %v550_v20 = vor.u32 %v549_v21, %v548_v9  ;;  %v555_v22 = vsel %vm551_vm6, %v535_v10, %v538_v16 }
  0x58   : > { %v556_v24 = vsel %vm554_vm10, %v544_v19, 2102212464  ;;  %v559_v27 = vsel %vm551_vm6, %v538_v16, %v541_v18  ;;  %v560_v29 = vsel %vm554_vm10, %v547_v17, 920167782  ;;  %v563_v28 = vsel %vm551_vm6, %v541_v18, %v544_v19 }
  0x59   : > { %v557_v26 = vsel %vm553_vm9, %v541_v18, %v556_v24  ;;  %v477_v30 = vadd.s32 536870912, %v476_v25  ;;  %v561_v31 = vsel %vm553_vm9, %v544_v19, %v560_v29  ;;  %v564_v32 = vsel %vm554_vm10, %v550_v20, 1326507024 }
  0x5a   : > { %v558_v33 = vsel %vm552_vm8, %v555_v22, %v557_v26  ;;  %v562_v34 = vsel %vm552_vm8, %v559_v27, %v561_v31  ;;  %v565_v35 = vsel %vm553_vm9, %v547_v17, %v564_v32  ;;  %v472_v55 = vadd.s32 %v1922_v61, %v1919_v60 }
  0x5b   : > { %v478_v36 = vshrl.u32 %v477_v30, 30  ;;  %v566_v37 = vsel %vm552_vm8, %v563_v28, %v565_v35  ;;  %v1935_v38 = vmul.u32.u64.low %v567_v58, %v562_v34  ;;  %v1936_v39 = vmul.u32.u64.high %v567_v58, %v562_v34, %v1935_v38 }
  0x5c   : > { %v1938_v40 = vmul.u32.u64.low %v567_v58, %v566_v37  ;;  %v1939_v41 = vmul.u32.u64.high %v567_v58, %v566_v37, %v1938_v40  ;;  %v574_v43 = vmul.u32 %v567_v58, %v558_v33  ;;  %vm520_vm1 = vcmp.le.f32.partialorder %v519_v8, 0.7853982 }
  0x5d   : > { %v479_v42 = vshll.u32 %v478_v36, 30  ;;  %v577_v45 = vadd.s32 1, %v1936_v39  ;;  %v502_v14 = vsub.s32 4, %v478_v36  ;;  %vm508_vm8 = vweird.f32 %v1894_v0 }
  0x5e   : > { %vm576_vm11 = vc.u32 %v1939_v41, %v1935_v38  ;;  %v575_v60 = vadd.s32 %v1935_v38, %v1939_v41 }
  0x5f   : > { %v480_v44 = vsub.s32 %v476_v25, %v479_v42  ;;  %v578_v47 = vsel %vm576_vm11, %v577_v45, %v1936_v39  ;;  %v503_v23 = vsel %vm418_vm14, %v502_v14, %v478_v36 }
  0x60   : > { %v579_v48 = vadd.s32 %v578_v47, %v574_v43  ;;  %v505_v24 = vsel %vm417_vm15, 0, %v503_v23  ;;  %v622_v47 = vstv %s411_s17 }
  0x61   : > { %v482_v46 = vsub.s32 0, %v480_v44  ;;  %v723_v30 = vadd.s32 3, %v505_v24  ;;  %v509_v33 = vand.u32 3, %v505_v24 }
  0x62   : > { %v580_v50 = vadd.s32 536870912, %v579_v48 }
  0x63   : > { %v1277_v49 = vmin.u32 %v482_v46, %v480_v44  ;;  %v724_v34 = vand.u32 3, %v723_v30  ;;  %vm514_vm2 = vcmp.eq.s32.totalorder %v509_v33, 2  ;;  %vm511_vm4 = vcmp.eq.s32.totalorder %v509_v33, 0 }
  0x64   : > { %v581_v52 = vshrl.u32 %v580_v50, 30  ;;  %vm510_vm6 = vcmp.lt.s32.totalorder %v509_v33, 2 }
  0x65   : > { %v484_v51 = vclz %v1277_v49  ;;  %vm729_vm3 = vcmp.eq.s32.totalorder %v724_v34, 2  ;;  %vm726_vm5 = vcmp.eq.s32.totalorder %v724_v34, 0  ;;  %vm725_vm7 = vcmp.lt.s32.totalorder %v724_v34, 2 }
  0x66   : > { %v582_v54 = vshll.u32 %v581_v52, 30  ;;  %v605_v32 = vsub.s32 4, %v581_v52 }
  0x67   : > { %v1278_v53 = vadd.s32 4294967294, %v484_v51 }
  0x68   : > { %v583_v57 = vsub.s32 %v579_v48, %v582_v54  ;;  %v606_v36 = vsel %vm521_vm0, %v605_v32, %v581_v52  ;;  %v625_v52 = vstv %s413_s18 }
  0x69   : > { %vm1279_vm12 = vcmp.lt.s32.totalorder %v1278_v53, 0  ;;  %v608_v40 = vsel %vm520_vm1, 0, %v606_v36 }
  0x6a   : > { %v487_v56 = vsel %vm1279_vm12, 0, %v1278_v53  ;;  %v585_v63 = vsub.s32 0, %v583_v57  ;;  %v827_v45 = vadd.s32 3, %v608_v40 }
  0x6b   : > { %v488_v58 = vsub.s32 32, %v487_v56  ;;  %v489_v59 = vshll.u32 %v480_v44, %v487_v56  ;;  %v492_v62 = vsub.s32 4294967266, %v487_v56 }
  0x6c   : > { %v1281_v5 = vmin.u32 %v585_v63, %v583_v57 }
  0x6d   : > { %v490_v2 = vshrl.u32 %v472_v55, %v488_v58  ;;  %v493_v4 = vadd.s32 127, %v492_v62  ;;  %v612_v55 = vand.u32 3, %v608_v40 }
  0x6e   : > { %v587_v9 = vclz %v1281_v5 }
  0x6f   : > { %v491_v6 = vor.u32 %v490_v2, %v489_v59  ;;  %v494_v7 = vshll.u32 %v493_v4, 23  ;;  %vm617_vm9 = vcmp.eq.s32.totalorder %v612_v55, 2  ;;  %vm614_vm11 = vcmp.eq.s32.totalorder %v612_v55, 0 }
  0x70   : > { %v1282_v12 = vadd.s32 4294967294, %v587_v9 }
  0x71   : > { %v495_v10 = vor.u32 4788187, %v494_v7  ;;  %v498_v11 = vcvt.s32.f32 %v491_v6 }
  0x72   : > { %vm1283_vm13 = vcmp.lt.s32.totalorder %v1282_v12, 0 }
  0x73   : > { %v496_v13 = vand.u32 2147483647, %v495_v10  ;;  %v590_v15 = vsel %vm1283_vm13, 0, %v1282_v12  ;;  %vm613_vm13 = vcmp.lt.s32.totalorder %v612_v55, 2 }
  0x74   : > { %v591_v16 = vsub.s32 32, %v590_v15  ;;  %v592_v18 = vshll.u32 %v583_v57, %v590_v15  ;;  %v595_v19 = vsub.s32 4294967266, %v590_v15  ;;  %v828_v57 = vand.u32 3, %v827_v45 }
  0x75   : > { %v499_v61 = vmul.f32 %v498_v11, %v496_v13 }
  0x76   : > { %v593_v17 = vshrl.u32 %v575_v60, %v591_v16  ;;  %v596_v25 = vadd.s32 127, %v595_v19  ;;  %vm833_vm10 = vcmp.eq.s32.totalorder %v828_v57, 2  ;;  %vm830_vm12 = vcmp.eq.s32.totalorder %v828_v57, 0 }
  0x77   : > { %v500_v21 = vxor.u32 2147483648, %v499_v61 }
  0x78   : > { %v594_v26 = vor.u32 %v593_v17, %v592_v18  ;;  %v597_v27 = vshll.u32 %v596_v25, 23 }
  0x79   : > { %v501_v20 = vsel %vm418_vm14, %v500_v21, %v499_v61  ;;  %vm829_vm14 = vcmp.lt.s32.totalorder %v828_v57, 2 }
  0x7a   : > { %v504_v22 = vsel %vm417_vm15, %v1894_v0, %v501_v20  ;;  %v598_v29 = vor.u32 4788187, %v597_v27  ;;  %v601_v28 = vcvt.s32.f32 %v594_v26  ;;  %vm611_vm15 = vweird.f32 %v1901_v3 }
  0x7b   : > { %1575 = vcosq.f32 %v504_v22 }
  0x7c   : > { %1577 = vsinq.f32 %v504_v22  ;;  %v599_v31 = vand.u32 2147483647, %v598_v29 }
  0x7e   : > { %v602_v1 = vmul.f32 %v601_v28, %v599_v31 }
  0x80   : > { %v603_v35 = vxor.u32 2147483648, %v602_v1 }
  0x82   : > { %v604_v37 = vsel %vm521_vm0, %v603_v35, %v602_v1 }
  0x83   : > { %v607_v39 = vsel %vm520_vm1, %v1901_v3, %v604_v37 }
  0x84   : > { %1579 = vcosq.f32 %v607_v39 }
  0x85   : > { %v1576_v38 = vpop.eup %1575  ;;  %1581 = vsinq.f32 %v607_v39 }
  0x86   : > { %v1578_v41 = vpop.eup %1577  ;;  %v515_v42 = vxor.u32 2147483648, %v1576_v38 }
  0x87   : > { %v512_v43 = vxor.u32 2147483648, %v1578_v41 }
  0x88   : > { %v516_v8 = vsel %vm514_vm2, %v515_v42, %v1578_v41  ;;  %v731_v44 = vsel %vm729_vm3, %v515_v42, %v1578_v41 }
  0x89   : > { %v513_v46 = vsel %vm511_vm4, %v1576_v38, %v512_v43  ;;  %v728_v48 = vsel %vm726_vm5, %v1576_v38, %v512_v43 }
  0x8a   : > { %v517_v49 = vsel %vm510_vm6, %v513_v46, %v516_v8  ;;  %v732_v50 = vsel %vm725_vm7, %v728_v48, %v731_v44 }
  0x8b   : > { %v518_v51 = vsel %vm508_vm8, nan, %v517_v49  ;;  %v733_v53 = vsel %vm508_vm8, nan, %v732_v50 }
  0x8c   : > { %v623_v54 = vmul.f32 %v622_v47, %v518_v51  ;;  %v838_v56 = vmul.f32 %v733_v53, %v622_v47 }
  0x8e   : > { %v626_v58 = vadd.f32 %v625_v52, %v623_v54  ;;  %v840_v59 = vadd.f32 %v838_v56, %v625_v52  ;;  %v1580_v62 = vpop.eup %1579 }
  0x8f   : > { %v1582_v0 = vpop.eup %1581  ;;  %v618_v63 = vxor.u32 2147483648, %v1580_v62 }
  0x90   : > { %628 = vst [vmem:[#allocation2] sm:$0xff] %v626_v58  ;;  %842 = vst [vmem:[#allocation3] sm:$0xff] %v840_v59  ;;  %v615_v2 = vxor.u32 2147483648, %v1582_v0 }
  0x91   : > { %v619_v4 = vsel %vm617_vm9, %v618_v63, %v1582_v0  ;;  %v835_v5 = vsel %vm833_vm10, %v618_v63, %v1582_v0 }
  0x92   : > { %v616_v6 = vsel %vm614_vm11, %v1580_v62, %v615_v2  ;;  %v832_v7 = vsel %vm830_vm12, %v1580_v62, %v615_v2 }
  0x93   : > { %v620_v9 = vsel %vm613_vm13, %v616_v6, %v619_v4  ;;  %v836_v10 = vsel %vm829_vm14, %v832_v7, %v835_v5 }
  0x94   : > { %v621_v11 = vsel %vm611_vm15, nan, %v620_v9  ;;  %v837_v12 = vsel %vm611_vm15, nan, %v836_v10 }
  0x95   : > { %v624_v13 = vmul.f32 %v622_v47, %v621_v11  ;;  %v839_v14 = vmul.f32 %v837_v12, %v622_v47 }
  0x97   : > { %v627_v60 = vadd.f32 %v625_v52, %v624_v13  ;;  %v841_v61 = vadd.f32 %v839_v14, %v625_v52 }
  0x99   : > { %629 = vst [vmem:[#allocation2 + $0x8] sm:$0xff] %v627_v60  ;;  %843 = vst [vmem:[#allocation3 + $0x8] sm:$0xff] %v841_v61 }
  0x9a PF: > { %v848_v3 = vld [vmem:[%s2115_s2] sm:$0xff]  ;;  %v849_v15 = vld [vmem:[%s2115_s2 + $0x8] sm:$0xff]  ;;  %v850_v16 = vld [vmem:[%s2115_s2 + $0x10] sm:$0xff]  ;;  %s1294_s18 = sshll.u32 %s1712_s24, 1  ;;  %s1295_s19 = sshll.u32 %s1716_s25, 3 }
  0x9b   : > { %v1408_v18 = vpack.c.bf16 %v849_v15, %v848_v3  ;;  %v851_v19 = vld [vmem:[%s2115_s2 + $0x18] sm:$0xff]  ;;  %v852_v23 = vld [vmem:[%s2115_s2 + $0x20] sm:$0xff]  ;;  %v853_v17 = vld [vmem:[%s2115_s2 + $0x28] sm:$0xff]  ;;  %s1054_s16 = sadd.s32 %s1295_s19, %s1294_s18  ;;  %s1077_s13 = sshll.u32 %s1888_s26, 4  ;;  %s2027_s13 = int_to_ptr.vmem [resolvable:$true] %s1077_s13 }
  0x9c   : > { %v1412_v21 = vpack.c.bf16 %v851_v19, %v850_v16  ;;  %v1416_v25 = vpack.c.bf16 %v853_v17, %v852_v23  ;;  %v864_v20 = vld [vmem:[%s1879_s29] sm:$0xff]  ;;  %v854_v22 = vld [vmem:[%s2115_s2 + $0x30] sm:$0xff]  ;;  %v855_v24 = vld [vmem:[%s2115_s2 + $0x38] sm:$0xff]  ;;  %s1296_s30 = sshll.u32 %s1054_s16, 7  ;;  %s1035_s8 = scalar_lea.sflag [#allocation5], %s1869_s9 }
  0x9d   : > { %1409 = vmatprep.subr.bf16.mxu0 %v1408_v18  ;;  %1441 = vmatprep.subr.bf16.mxu1 %v1408_v18  ;;  %v866_v26 = vld [vmem:[%s1884_s7] sm:$0xff]  ;;  %v1420_v27 = vpack.c.bf16 %v855_v24, %v854_v22  ;;  %v857_v28 = vld [vmem:[%s2115_s2 + $0x48] sm:$0xff]  ;;  %v858_v31 = vld [vmem:[%s2115_s2 + $0x50] sm:$0xff]  ;;  %s2025_s0 = scalar_lea.hbm %s2119_s6, %s1296_s30  ;;  %s1737_s17 = smov [#allocation7]  }
  0x9e   : > { %1411 = vmatpush3.bf16.msra.mxu0 %v1408_v18  ;;  %1443 = vmatpush3.bf16.msra.mxu1 %v1408_v18  ;;  %v856_v29 = vld [vmem:[%s2115_s2 + $0x40] sm:$0xff]  ;;  %v859_v32 = vld [vmem:[%s2115_s2 + $0x58] sm:$0xff]  ;;  %v861_v34 = vld [vmem:[%s2115_s2 + $0x68] sm:$0xff]  ;;  %s1602_s18 = sshll.u32 %s1737_s17, 4  ;;  %s1603_s18 = int_to_ptr.vmem [resolvable:$false] %s1602_s18 }
  0x9f   : > { %1413 = vmatprep.subr.bf16.mxu0 %v1412_v21  ;;  %1445 = vmatprep.subr.bf16.mxu1 %v1412_v21  ;;  %v1424_v30 = vpack.c.bf16 %v857_v28, %v856_v29  ;;  %v1428_v1 = vpack.c.bf16 %v859_v32, %v858_v31  ;;  %v860_v33 = vld [vmem:[%s2115_s2 + $0x60] sm:$0xff]  ;;  %v862_v36 = vld [vmem:[%s2115_s2 + $0x70] sm:$0xff]  ;;  %v863_v37 = vld [vmem:[%s2115_s2 + $0x78] sm:$0xff]  ;;  %s1604_s19 = scalar_lea.vmem %s1603_s18, 512 }
  0xa0   : > { %1370 = vmatprep.mubr.f32.mxu0 %v864_v20  ;;  %1405 = vmatprep.mubr.f32.mxu1 %v866_v26  ;;  %v1432_v35 = vpack.c.bf16 %v861_v34, %v860_v33  ;;  %v1436_v38 = vpack.c.bf16 %v863_v37, %v862_v36  ;;  %v865_v39 = vld [vmem:[%s1879_s29 + $0x8] sm:$0xff]  ;;  %v844_v42 = vld [vmem:[#allocation2] sm:$0xff]  ;;  %v847_v43 = vld [vmem:[#allocation3 + $0x8] sm:$0xff]  ;;  %s2015_s29 = scalar_lea.hbm %s2118_s5, %s1296_s30 }
  0xa1   : > { %v867_v40 = vld [vmem:[%s1884_s7 + $0x8] sm:$0xff]  ;;  %v846_v45 = vld [vmem:[#allocation3] sm:$0xff]  ;;  %v1018_v46 = vmul.f32 %v864_v20, %v844_v42  ;;  %v1026_v47 = vmul.f32 %v866_v26, %v844_v42  ;;  %s1057_s7 = sshll.u32 %s1886_s27, 4  ;;  %s2018_s7 = int_to_ptr.vmem [resolvable:$true] %s1057_s7 }
  0xa2   : > { %1415 = vmatpush3.bf16.msra.mxu0 %v1412_v21  ;;  %1447 = vmatpush3.bf16.msra.mxu1 %v1412_v21  ;;  %v845_v41 = vld [vmem:[#allocation2 + $0x8] sm:$0xff]  ;;  %s1598_s10 = scalar_lea.vmem %s2018_s7, 256  ;;  %p1605_p1 = scmp.lt.s32.totalorder %s2018_s7, %s1603_s18 }
  0xa3   : > { %1417 = vmatprep.subr.bf16.mxu0 %v1416_v25  ;;  %1449 = vmatprep.subr.bf16.mxu1 %v1416_v25  ;;  %v1019_v8 = vmul.f32 %v865_v39, %v845_v41  ;;  %v1027_v44 = vmul.f32 %v867_v40, %v845_v41  ;;  %p1599_p12 = scmp.ne.s32.totalorder %s2018_s7, %s1598_s10  ;;  %p1606_p2 = scmp.lt.s32.totalorder %s1604_s19, %s1598_s10 }
  0xa5   : > { %p1600_p13 = pnand %p1599_p12, %p1828_p3  ;;  %p1607_p4 = por %p1606_p2, %p1605_p1 }
  0xa6   : > { %1419 = vmatpush3.bf16.msra.mxu0 %v1416_v25  ;;  %1451 = vmatpush3.bf16.msra.mxu1 %v1416_v25 }
  0xa7   : > { %1421 = vmatprep.subr.bf16.mxu0 %v1420_v27  ;;  %1453 = vmatprep.subr.bf16.mxu1 %v1420_v27  ;;  %p1601_p0 = pneg %p1600_p13 }
  0xa9   : > { %p1608_p5 = pnand %p1607_p4, %p1601_p0 }
  0xaa   : > { %1423 = vmatpush3.bf16.msra.mxu0 %v1420_v27  ;;  %1455 = vmatpush3.bf16.msra.mxu1 %v1420_v27 }
  0xab   : > { %1425 = vmatprep.subr.bf16.mxu0 %v1424_v30  ;;  %1457 = vmatprep.subr.bf16.mxu1 %v1424_v30 }
  0xae   : > { %1427 = vmatpush3.bf16.msra.mxu0 %v1424_v30  ;;  %1459 = vmatpush3.bf16.msra.mxu1 %v1424_v30 }
  0xaf   : > { %1429 = vmatprep.subr.bf16.mxu0 %v1428_v1  ;;  %1461 = vmatprep.subr.bf16.mxu1 %v1428_v1 }
  0xb2   : > { %1431 = vmatpush3.bf16.msra.mxu0 %v1428_v1  ;;  %1463 = vmatpush3.bf16.msra.mxu1 %v1428_v1 }
  0xb3   : > { %1433 = vmatprep.subr.bf16.mxu0 %v1432_v35  ;;  %1465 = vmatprep.subr.bf16.mxu1 %v1432_v35 }
  0xb6   : > { %1435 = vmatpush3.bf16.msra.mxu0 %v1432_v35  ;;  %1467 = vmatpush3.bf16.msra.mxu1 %v1432_v35 }
  0xb7   : > { %1437 = vmatprep.subr.bf16.mxu0 %v1436_v38  ;;  %1469 = vmatprep.subr.bf16.mxu1 %v1436_v38 }
  0xba   : > { %1439 = vmatpush3.bf16.msra.mxu0 %v1436_v38  ;;  %1471 = vmatpush3.bf16.msra.mxu1 %v1436_v38 }
  0xbd   : > { %1371 = vmatmul.mubr.f32.vlgmr.msra.gmra.mrb[0].mxu0 %v865_v39  ;;  %1406 = vmatmul.mubr.f32.vlgmr.msra.gmra.mrb[0].mxu1 %v867_v40 }
 0x190   : > { %v1372_v48 = vpop.f32.mrb[0].mxu0  ;;  %v1407_v49 = vpop.f32.mrb[0].mxu1 }
 0x191   : > { %v1021_v50 = vmul.f32 %v1372_v48, %v847_v43  ;;  %v1029_v51 = vmul.f32 %v1407_v49, %v847_v43  ;;  %v934_v52 = vpop.f32.mrb[1].mxu0  ;;  %v1009_v53 = vpop.f32.mrb[1].mxu1 }
 0x192   : > { %v1020_v54 = vmul.f32 %v934_v52, %v846_v45  ;;  %v1028_v55 = vmul.f32 %v1009_v53, %v846_v45 }
 0x193   : > { %v1023_v56 = vadd.f32 %v1021_v50, %v1019_v8  ;;  %v1031_v57 = vadd.f32 %v1029_v51, %v1027_v44 }
 0x194   : > { %v1022_v58 = vadd.f32 %v1020_v54, %v1018_v46  ;;  %v1030_v59 = vadd.f32 %v1028_v55, %v1026_v47 }
 0x195   : > { %1025 = vst [vmem:[%s1886_s27 + $0x8] sm:$0xff] %v1023_v56  ;;  %1033 = vst [vmem:[%s1888_s26 + $0x8] sm:$0xff] %v1031_v57 }
 0x196   : > { %1024 = vst [vmem:[%s1886_s27] sm:$0xff] %v1022_v58  ;;  %1032 = vst [vmem:[%s1888_s26] sm:$0xff] %v1030_v59 }
 0x197   : > { %1611 = shalt.err (!%p1608_p5)
}
 0x198   : > { %s1612_s26 = scalar_lea.hbm %s2015_s29, 256  ;;  %s1616_s30 = scalar_lea.hbm %s2118_s5, 2048 }
 0x199   : > { %p1613_p6 = scmp.ne.s32.totalorder %s2015_s29, %s1612_s26  ;;  %p1617_p8 = scmp.lt.u32.totalorder %s2015_s29, %s2118_s5 }
 0x19a   : > { %p1618_p11 = scmp.lt.u32.totalorder %s1616_s30, %s1612_s26  ;;  %p1620_p12 = scmp.lt.u32.totalorder %s1612_s26, %s2015_s29 }
 0x19b   : > { %p1614_p7 = pnand %p1613_p6, %p1828_p3 }
 0x19c   : > { %p1619_p10 = por %p1618_p11, %p1617_p8 }
 0x19d   : > { %p1615_p9 = pneg %p1614_p7 }
 0x19e   : > { %p1621_p13 = por %p1620_p12, %p1619_p10 }
 0x1a0   : > { %p1622_p0 = pnand %p1621_p13, %p1615_p9 }
 0x1a2   : > { %1625 = shalt.err (!%p1622_p0)
}
 0x1a3   : > { %s1738_s14 = smov 128   ;;  %s1739_s15 = smov 8  }
 0x1a4   : > { %1484 = dma.vmem_to_hbm [thread:$0]  (%p1828_p3), %s2018_s7, 256, %s2015_s29, %s1035_s8, %s1738_s14, %s1738_s14, %s1739_s15  }
 0x1a5   : > { %s1040_s10 = scalar_lea.sflag [#allocation9], %s1869_s9  ;;  %s1626_s17 = scalar_lea.vmem %s2027_s13, 256 }
 0x1a6   : > { %p1627_p1 = scmp.ne.s32.totalorder %s2027_s13, %s1626_s17  ;;  %s1740_s18 = smov [#allocation8]  }
 0x1a7   : > { %s1630_s19 = sshll.u32 %s1740_s18, 4  ;;  %s1631_s19 = int_to_ptr.vmem [resolvable:$false] %s1630_s19 }
 0x1a8   : > { %p1628_p2 = pnand %p1627_p1, %p1828_p3  ;;  %s1632_s26 = scalar_lea.vmem %s1631_s19, 512 }
 0x1a9   : > { %p1633_p5 = scmp.lt.s32.totalorder %s2027_s13, %s1631_s19  ;;  %p1634_p6 = scmp.lt.s32.totalorder %s1632_s26, %s1626_s17 }
 0x1aa   : > { %p1629_p4 = pneg %p1628_p2 }
 0x1ab   : > { %p1635_p7 = por %p1634_p6, %p1633_p5 }
 0x1ad   : > { %p1636_p9 = pnand %p1635_p7, %p1629_p4 }
 0x1af   : > { %1639 = shalt.err (!%p1636_p9)
}
 0x1b0   : > { %s1640_s7 = scalar_lea.hbm %s2025_s0, 256  ;;  %s1644_s27 = scalar_lea.hbm %s2119_s6, 2048 }
 0x1b1   : > { %p1641_p8 = scmp.ne.s32.totalorder %s2025_s0, %s1640_s7  ;;  %p1645_p12 = scmp.lt.u32.totalorder %s2025_s0, %s2119_s6 }
 0x1b2   : > { %p1646_p13 = scmp.lt.u32.totalorder %s1644_s27, %s1640_s7  ;;  %p1648_p1 = scmp.lt.u32.totalorder %s1640_s7, %s2025_s0 }
 0x1b3   : > { %p1642_p11 = pnand %p1641_p8, %p1828_p3 }
 0x1b4   : > { %p1647_p0 = por %p1646_p13, %p1645_p12 }
 0x1b5   : > { %p1643_p10 = pneg %p1642_p11 }
 0x1b6   : > { %p1649_p2 = por %p1648_p1, %p1647_p0 }
 0x1b8   : > { %p1650_p4 = pnand %p1649_p2, %p1643_p10 }
 0x1ba   : > { %1653 = shalt.err (!%p1650_p4)
}
 0x1bb   : > { %1485 = dma.vmem_to_hbm [thread:$0]  (%p1828_p3), %s2027_s13, 256, %s2025_s0, %s1040_s10, %s1738_s14, %s1738_s14, %s1739_s15  }
 0x1bc PF: > { %p1501_p5 = scmp.ge.s32.totalorder %s1728_s28, 2  ;;  %s1092_s24 = sand.u32 1, %s1700_s21  }
 0x1bd   : > { %p2134_p6 = scmp.ne.s32.totalorder %s2130_s12, 0  ;;  %s1093_s25 = scalar_lea.sflag [#allocation5], %s1092_s24 }
 0x1bf   : > { %p1493_p7 = pnand %p1501_p5, %p2134_p6 }
 0x1c1   : > { %1691 = dma.done.wait (!%p1493_p7), %s1093_s25, 256  }
 0x1c2   : > { %1693 = vsyncadd (!%p1493_p7), %s1093_s25, 4294967040  ;;  %s1102_s11 = scalar_lea.sflag [#allocation9], %s1092_s24 }
 0x1c3   : > { %1695 = dma.done.wait (!%p1493_p7), %s1102_s11, 256  }
 0x1c4   : > { %1697 = vsyncadd (!%p1493_p7), %s1102_s11, 4294967040  ;;  %s24_s28 = sadd.s32 1, %s1728_s28   ;;  %s2135_s24 = sld [smem:[#allocation13_spill]] }
 0x1c5   : > { %p21_p9 = scmp.ge.s32.totalorder %s24_s28, 10   ;;  %s2136_s25 = sld [smem:[#allocation14_spill]] }
 0x1c6   : > { %s2137_s26 = sld [smem:[#allocation15_spill]]  ;;  %s2138_s27 = sld [smem:[#allocation16_spill]] }
 0x1c7   : > { %s2139_s21 = smov %s1704_s22  ;;  %s2140_s22 = smov %s1708_s23 }
 0x1c8   : > { %s2141_s23 = smov %s1858_s20  ;;  %23 = sbr.rel (!%p21_p9) target bundleno = 10 (0xa), region = 107 }
 0x1cf   :  { %1107 = vsyncpa [#allocation5], 1 }
 0x1d0   :  { %1109 = vsyncpa [#allocation5 + $0x1], 1 }
 0x1d1   :  { %1110 = vsyncpa [#allocation9], 1 }
 0x1d2   :  { %1112 = vsyncpa [#allocation9 + $0x1], 1 }
 0x1d3   :  { %1113 = vsyncpa [#allocation6], 1 }
 0x1d4   :  { %1115 = vsyncpa [#allocation6 + $0x1], 1 }

</bundles_post_ra>
